<compile_context>
chip_gen: v7x
topology: tpu7x:2x2x1
jax: 0.10.0
libtpu: 0.0.40
codegen_flags: <defaults>
</compile_context>

<pallas_src>
import functools

import jax
import jax.numpy as jnp
from jax.experimental import pallas as pl
from jax.experimental.pallas import tpu as pltpu


_WSLOT = 16  # per-layer slot size inside the packed GCN weight tile


# ------------------------------------------------------------------ kernel ---

def fused_kernel(a_ref, x_ref, wg_ref, misc_ref, o_ref,
                 h3_s, xf_s, z_s, x4_s, h6_s,
                 *, batch, nn, gcn_dims, e2, e3):
    """Whole model3_variant2 forward in a single kernel invocation."""
    f32 = jnp.float32
    a = a_ref[...]                                    # [N_total, N_total]
    bias_base = nn * e2                               # first bias row in misc

    def gcn(h, layer, bias_row, relu):
        # GCNConv: A_hat @ (X @ W) + b, optional fused ReLU epilogue.
        fin, fout = gcn_dims[layer]
        w = wg_ref[:fin, layer * _WSLOT: layer * _WSLOT + fout]
        y = jnp.dot(h, w, preferred_element_type=f32)
        y = jnp.dot(a, y, preferred_element_type=f32)
        y = y + misc_ref[bias_base + bias_row: bias_base + bias_row + 1, :fout]
        return jnp.maximum(y, 0.0) if relu else y

    # conv1 / conv2 (+ReLU), conv3 (no activation)
    h = gcn(x_ref[...], 0, 0, True)
    h = gcn(h, 1, 1, True)
    h3_s[...] = gcn(h, 2, 2, False)                   # [N_total, e2]

    # x.view(-1, nn*e2): gather node rows into per-graph flat rows.
    for b in range(batch):
        for n in range(nn):
            xf_s[b:b + 1, n * e2:(n + 1) * e2] = \
                h3_s[b * nn + n: b * nn + n + 1, :]

    # encoder + decoder, fused into one Linear (no activation between them).
    w_ed = misc_ref[0:nn * e2, 0:nn * e3]
    z_s[...] = (jnp.dot(xf_s[...], w_ed, preferred_element_type=f32)
                + misc_ref[bias_base + 3: bias_base + 4, :nn * e3])

    # x.view(-1, e3): scatter flat rows back to node rows.
    for b in range(batch):
        for m in range(nn):
            x4_s[b * nn + m: b * nn + m + 1, :] = \
                z_s[b:b + 1, m * e3:(m + 1) * e3]

    # conv4 / conv5 (+ReLU), conv6 (+ReLU -- model3_variant2 applies self.act).
    h = gcn(x4_s[...], 3, 4, True)
    h = gcn(h, 4, 5, True)
    h6_s[...] = gcn(h, 5, 6, True)                    # [N_total, 1]

    # x.view(-1, num_nodes): only HBM store of the whole forward pass.
    for b in range(batch):
        for m in range(nn):
            o_ref[b:b + 1, m:m + 1] = h6_s[b * nn + m: b * nn + m + 1, 0:1]


# ----------------------------------------------------------------- wrapper ---

def _full_spec(shape):
    # whole-array block (no grid): single kernel invocation, everything in VMEM
    return pl.BlockSpec(shape, lambda: (0,) * len(shape))


def forward(params, x, a_hat, *, batch, num_nodes, num_features, emb):
    n_total = batch * num_nodes
    e2, e3 = emb[2], emb[3]
    gcn_dims = ((num_features, emb[0]), (emb[0], emb[1]), (emb[1], emb[2]),
                (emb[3], emb[4]), (emb[4], emb[5]), (emb[5], 1))

    in_arrays = [a_hat, x, params["w_gcn_pack"], params["misc_pack"]]

    # advisory cost estimate for XLA's scheduler
    flops = 0
    for fin, fout in gcn_dims:
        flops += 2 * n_total * fin * fout + 2 * n_total * n_total * fout
    flops += 2 * batch * (num_nodes * e2) * (num_nodes * e3)
    bytes_accessed = sum(int(v.size) * 4 for v in in_arrays) + batch * num_nodes * 4

    kernel = functools.partial(fused_kernel, batch=batch, nn=num_nodes,
                               gcn_dims=gcn_dims, e2=e2, e3=e3)
    return pl.pallas_call(
        kernel,
        out_shape=jax.ShapeDtypeStruct((batch, num_nodes), jnp.float32),
        in_specs=[_full_spec(v.shape) for v in in_arrays],
        out_specs=_full_spec((batch, num_nodes)),
        scratch_shapes=[
            pltpu.VMEM((n_total, e2), jnp.float32),            # conv3 output
            pltpu.VMEM((batch, num_nodes * e2), jnp.float32),  # flattened enc input
            pltpu.VMEM((batch, num_nodes * e3), jnp.float32),  # dec output
            pltpu.VMEM((n_total, e3), jnp.float32),            # conv4 input
            pltpu.VMEM((n_total, 1), jnp.float32),             # conv6 output
        ],
        cost_estimate=pl.CostEstimate(flops=int(flops), transcendentals=0,
                                      bytes_accessed=int(bytes_accessed)),
    )(*in_arrays)


# ------------------------------------------------------------------- setup ---

def init_params(key, num_nodes, num_features, emb, latent_dim):
    def glorot(k, shape):
        fan_in, fan_out = shape
        lim = jnp.sqrt(6.0 / (fan_in + fan_out))
        return jax.random.uniform(k, shape, jnp.float32, -lim, lim)

    keys = jax.random.split(key, 8)
    gcn_dims = ((num_features, emb[0]), (emb[0], emb[1]), (emb[1], emb[2]),
                (emb[3], emb[4]), (emb[4], emb[5]), (emb[5], 1))
    gcn_keys = (keys[0], keys[1], keys[2], keys[5], keys[6], keys[7])

    # Pack all six GCNConv weights [in, out] into one (16, 96) lane-dense tile:
    # layer i lives at rows [:fin], cols [i*16 : i*16+fout].
    wpack = jnp.zeros((_WSLOT, len(gcn_dims) * _WSLOT), jnp.float32)
    for i, ((fin, fout), k) in enumerate(zip(gcn_dims, gcn_keys)):
        wpack = wpack.at[:fin, i * _WSLOT: i * _WSLOT + fout].set(
            glorot(k, (fin, fout)))

    # Encoder / Decoder Linear layers, collapsed into one affine map
    # (valid because there is no activation between them and the latent is
    #  never an exposed output).
    e2, e3 = emb[2], emb[3]
    enc_w = glorot(keys[3], (num_nodes * e2, latent_dim))
    enc_b = jnp.zeros((latent_dim,), jnp.float32)
    dec_w = glorot(keys[4], (latent_dim, num_nodes * e3))
    dec_b = jnp.zeros((num_nodes * e3,), jnp.float32)
    w_ed = enc_w @ dec_w                              # [nn*e2, nn*e3]
    b_ed = enc_b @ dec_w + dec_b                      # [nn*e3]

    # misc pack: rows [0, nn*e2) = W_ed, rows [nn*e2, nn*e2+8) = bias rows
    # (0..2 -> conv1..3, 3 -> fused enc/dec, 4..6 -> conv4..6).
    misc_cols = max(num_nodes * e3, max(fout for _, fout in gcn_dims))
    misc_rows = num_nodes * e2 + 8
    misc = jnp.zeros((misc_rows, misc_cols), jnp.float32)
    misc = misc.at[:num_nodes * e2, :num_nodes * e3].set(w_ed)
    # GCNConv biases are zero-initialized (PyG default) -> already zero rows.
    misc = misc.at[num_nodes * e2 + 3, :num_nodes * e3].set(b_ed)

    return {"w_gcn_pack": wpack, "misc_pack": misc}


def gcn_norm_adj(edge_index, n_total):
    # dense D^-1/2 (A + I) D^-1/2 (PyG GCNConv default normalization)
    src, dst = edge_index[0], edge_index[1]
    a = jnp.zeros((n_total, n_total), jnp.float32).at[dst, src].add(1.0)
    a = a + jnp.eye(n_total, dtype=jnp.float32)
    deg = a.sum(axis=1)
    dinv = jnp.where(deg > 0, 1.0 / jnp.sqrt(deg), 0.0)
    return dinv[:, None] * a * dinv[None, :]


# -------------------------------------------------------------------- main ---

if __name__ == "__main__":
    batch_size = 2
    num_nodes = 8
    num_features = 4
    embedding_sequence = (16, 8, 4, 4, 8, 16)
    latent_space_dim = 32
    n_total = batch_size * num_nodes

    key = jax.random.PRNGKey(0)
    k_param, k_x = jax.random.split(key)

    params = init_params(k_param, num_nodes, num_features,
                         embedding_sequence, latent_space_dim)

    # node features: [batch * num_nodes, num_features]
    x = jax.random.normal(k_x, (n_total, num_features), jnp.float32)

    # edge_index: bidirectional ring within each graph in the batch
    src_list, dst_list = [], []
    for b in range(batch_size):
        off = b * num_nodes
        for i in range(num_nodes):
            j = (i + 1) % num_nodes
            src_list += [off + i, off + j]
            dst_list += [off + j, off + i]
    edge_index = jnp.array([src_list, dst_list], dtype=jnp.int32)

    a_hat = gcn_norm_adj(edge_index, n_total)

    fwd = jax.jit(functools.partial(forward,
                                    batch=batch_size,
                                    num_nodes=num_nodes,
                                    num_features=num_features,
                                    emb=embedding_sequence))
    out = fwd(params, x, a_hat)
    out = jax.block_until_ready(out)

    assert out.shape == (batch_size, num_nodes), out.shape
    assert bool(jnp.all(jnp.isfinite(out)))
    assert bool(jnp.all(out >= 0.0))          # final layer is conv6 + ReLU
    print("KERNEL_OK")
</pallas_src>

<mosaic_0001>
module attributes {stable_mosaic.version = 11 : i64} {
  func.func @fused_kernel(%arg0: memref<16x16xf32, #tpu.memory_space<vmem>>, %arg1: memref<16x4xf32, #tpu.memory_space<vmem>>, %arg2: memref<16x96xf32, #tpu.memory_space<vmem>>, %arg3: memref<40x32xf32, #tpu.memory_space<vmem>>, %arg4: memref<2x8xf32, #tpu.memory_space<vmem>>, %arg5: memref<16x4xf32, #tpu.memory_space<vmem>>, %arg6: memref<2x32xf32, #tpu.memory_space<vmem>>, %arg7: memref<2x32xf32, #tpu.memory_space<vmem>>, %arg8: memref<16x4xf32, #tpu.memory_space<vmem>>, %arg9: memref<16x1xf32, #tpu.memory_space<vmem>>) attributes {dimension_semantics = [], scalar_prefetch = 0 : i64, scratch_operands = 5 : i64, tpu.core_type = #tpu.core_type<tc>} {
    %c0 = arith.constant 0 : index
    %c0_0 = arith.constant 0 : index
    %0 = vector.load %arg0[%c0, %c0_0] : memref<16x16xf32, #tpu.memory_space<vmem>>, vector<16x16xf32>
    %c0_1 = arith.constant 0 : index
    %c0_2 = arith.constant 0 : index
    %1 = vector.load %arg1[%c0_1, %c0_2] : memref<16x4xf32, #tpu.memory_space<vmem>>, vector<16x4xf32>
    %c0_3 = arith.constant 0 : index
    %c0_4 = arith.constant 0 : index
    %2 = vector.load %arg2[%c0_3, %c0_4] : memref<16x96xf32, #tpu.memory_space<vmem>>, vector<4x16xf32>
    %cst = arith.constant dense<0.000000e+00> : vector<16x16xf32>
    %3 = tpu.matmul %1, %2, %cst {dimension_numbers = #tpu.dot_dimension_numbers<[1], [0], [0], [1], [0, 0, 1, 1], [], []>} : vector<16x4xf32>, vector<4x16xf32>, vector<16x16xf32> -> vector<16x16xf32>
    %cst_5 = arith.constant dense<0.000000e+00> : vector<16x16xf32>
    %4 = tpu.matmul %0, %3, %cst_5 {dimension_numbers = #tpu.dot_dimension_numbers<[1], [0], [0], [1], [0, 0, 1, 1], [], []>} : vector<16x16xf32>, vector<16x16xf32>, vector<16x16xf32> -> vector<16x16xf32>
    %c32 = arith.constant 32 : index
    %c0_6 = arith.constant 0 : index
    %5 = vector.load %arg3[%c32, %c0_6] : memref<40x32xf32, #tpu.memory_space<vmem>>, vector<1x16xf32>
    %6 = vector.broadcast %5 : vector<1x16xf32> to vector<16x16xf32>
    %7 = arith.addf %4, %6 : vector<16x16xf32>
    %cst_7 = arith.constant 0.000000e+00 : f32
    %8 = vector.broadcast %cst_7 : f32 to vector<16x16xf32>
    %9 = arith.maximumf %7, %8 : vector<16x16xf32>
    %c0_8 = arith.constant 0 : index
    %c16 = arith.constant 16 : index
    %10 = vector.load %arg2[%c0_8, %c16] : memref<16x96xf32, #tpu.memory_space<vmem>>, vector<16x8xf32>
    %cst_9 = arith.constant dense<0.000000e+00> : vector<16x8xf32>
    %11 = tpu.matmul %9, %10, %cst_9 {dimension_numbers = #tpu.dot_dimension_numbers<[1], [0], [0], [1], [0, 0, 1, 1], [], []>} : vector<16x16xf32>, vector<16x8xf32>, vector<16x8xf32> -> vector<16x8xf32>
    %cst_10 = arith.constant dense<0.000000e+00> : vector<16x8xf32>
    %12 = tpu.matmul %0, %11, %cst_10 {dimension_numbers = #tpu.dot_dimension_numbers<[1], [0], [0], [1], [0, 0, 1, 1], [], []>} : vector<16x16xf32>, vector<16x8xf32>, vector<16x8xf32> -> vector<16x8xf32>
    %c33 = arith.constant 33 : index
    %c0_11 = arith.constant 0 : index
    %13 = vector.load %arg3[%c33, %c0_11] : memref<40x32xf32, #tpu.memory_space<vmem>>, vector<1x8xf32>
    %14 = vector.broadcast %13 : vector<1x8xf32> to vector<16x8xf32>
    %15 = arith.addf %12, %14 : vector<16x8xf32>
    %cst_12 = arith.constant 0.000000e+00 : f32
    %16 = vector.broadcast %cst_12 : f32 to vector<16x8xf32>
    %17 = arith.maximumf %15, %16 : vector<16x8xf32>
    %c0_13 = arith.constant 0 : index
    %c32_14 = arith.constant 32 : index
    %18 = vector.load %arg2[%c0_13, %c32_14] : memref<16x96xf32, #tpu.memory_space<vmem>>, vector<8x4xf32>
    %cst_15 = arith.constant dense<0.000000e+00> : vector<16x4xf32>
    %19 = tpu.matmul %17, %18, %cst_15 {dimension_numbers = #tpu.dot_dimension_numbers<[1], [0], [0], [1], [0, 0, 1, 1], [], []>} : vector<16x8xf32>, vector<8x4xf32>, vector<16x4xf32> -> vector<16x4xf32>
    %cst_16 = arith.constant dense<0.000000e+00> : vector<16x4xf32>
    %20 = tpu.matmul %0, %19, %cst_16 {dimension_numbers = #tpu.dot_dimension_numbers<[1], [0], [0], [1], [0, 0, 1, 1], [], []>} : vector<16x16xf32>, vector<16x4xf32>, vector<16x4xf32> -> vector<16x4xf32>
    %c34 = arith.constant 34 : index
    %c0_17 = arith.constant 0 : index
    %21 = vector.load %arg3[%c34, %c0_17] : memref<40x32xf32, #tpu.memory_space<vmem>>, vector<1x4xf32>
    %22 = vector.broadcast %21 : vector<1x4xf32> to vector<16x4xf32>
    %23 = arith.addf %20, %22 : vector<16x4xf32>
    %c0_18 = arith.constant 0 : index
    %c0_19 = arith.constant 0 : index
    %24 = vector.load %arg5[%c0_18, %c0_19] : memref<16x4xf32, #tpu.memory_space<vmem>>, vector<16x4xf32>
    tpu.vector_store %arg5[%c0_18, %c0_19], %23 {strides = array<i32>} : memref<16x4xf32, #tpu.memory_space<vmem>>, vector<16x4xf32>,
    %c0_20 = arith.constant 0 : index
    %c0_21 = arith.constant 0 : index
    %25 = vector.load %arg5[%c0_20, %c0_21] : memref<16x4xf32, #tpu.memory_space<vmem>>, vector<1x4xf32>
    %c0_22 = arith.constant 0 : index
    %c0_23 = arith.constant 0 : index
    %26 = vector.load %arg6[%c0_22, %c0_23] : memref<2x32xf32, #tpu.memory_space<vmem>>, vector<1x4xf32>
    tpu.vector_store %arg6[%c0_22, %c0_23], %25 {strides = array<i32>} : memref<2x32xf32, #tpu.memory_space<vmem>>, vector<1x4xf32>,
    %c1 = arith.constant 1 : index
    %c0_24 = arith.constant 0 : index
    %27 = vector.load %arg5[%c1, %c0_24] : memref<16x4xf32, #tpu.memory_space<vmem>>, vector<1x4xf32>
    %c0_25 = arith.constant 0 : index
    %c4 = arith.constant 4 : index
    %28 = vector.load %arg6[%c0_25, %c4] : memref<2x32xf32, #tpu.memory_space<vmem>>, vector<1x4xf32>
    tpu.vector_store %arg6[%c0_25, %c4], %27 {strides = array<i32>} : memref<2x32xf32, #tpu.memory_space<vmem>>, vector<1x4xf32>,
    %c2 = arith.constant 2 : index
    %c0_26 = arith.constant 0 : index
    %29 = vector.load %arg5[%c2, %c0_26] : memref<16x4xf32, #tpu.memory_space<vmem>>, vector<1x4xf32>
    %c0_27 = arith.constant 0 : index
    %c8 = arith.constant 8 : index
    %30 = vector.load %arg6[%c0_27, %c8] : memref<2x32xf32, #tpu.memory_space<vmem>>, vector<1x4xf32>
    tpu.vector_store %arg6[%c0_27, %c8], %29 {strides = array<i32>} : memref<2x32xf32, #tpu.memory_space<vmem>>, vector<1x4xf32>,
    %c3 = arith.constant 3 : index
    %c0_28 = arith.constant 0 : index
    %31 = vector.load %arg5[%c3, %c0_28] : memref<16x4xf32, #tpu.memory_space<vmem>>, vector<1x4xf32>
    %c0_29 = arith.constant 0 : index
    %c12 = arith.constant 12 : index
    %32 = vector.load %arg6[%c0_29, %c12] : memref<2x32xf32, #tpu.memory_space<vmem>>, vector<1x4xf32>
    tpu.vector_store %arg6[%c0_29, %c12], %31 {strides = array<i32>} : memref<2x32xf32, #tpu.memory_space<vmem>>, vector<1x4xf32>,
    %c4_30 = arith.constant 4 : index
    %c0_31 = arith.constant 0 : index
    %33 = vector.load %arg5[%c4_30, %c0_31] : memref<16x4xf32, #tpu.memory_space<vmem>>, vector<1x4xf32>
    %c0_32 = arith.constant 0 : index
    %c16_33 = arith.constant 16 : index
    %34 = vector.load %arg6[%c0_32, %c16_33] : memref<2x32xf32, #tpu.memory_space<vmem>>, vector<1x4xf32>
    tpu.vector_store %arg6[%c0_32, %c16_33], %33 {strides = array<i32>} : memref<2x32xf32, #tpu.memory_space<vmem>>, vector<1x4xf32>,
    %c5 = arith.constant 5 : index
    %c0_34 = arith.constant 0 : index
    %35 = vector.load %arg5[%c5, %c0_34] : memref<16x4xf32, #tpu.memory_space<vmem>>, vector<1x4xf32>
    %c0_35 = arith.constant 0 : index
    %c20 = arith.constant 20 : index
    %36 = vector.load %arg6[%c0_35, %c20] : memref<2x32xf32, #tpu.memory_space<vmem>>, vector<1x4xf32>
    tpu.vector_store %arg6[%c0_35, %c20], %35 {strides = array<i32>} : memref<2x32xf32, #tpu.memory_space<vmem>>, vector<1x4xf32>,
    %c6 = arith.constant 6 : index
    %c0_36 = arith.constant 0 : index
    %37 = vector.load %arg5[%c6, %c0_36] : memref<16x4xf32, #tpu.memory_space<vmem>>, vector<1x4xf32>
    %c0_37 = arith.constant 0 : index
    %c24 = arith.constant 24 : index
    %38 = vector.load %arg6[%c0_37, %c24] : memref<2x32xf32, #tpu.memory_space<vmem>>, vector<1x4xf32>
    tpu.vector_store %arg6[%c0_37, %c24], %37 {strides = array<i32>} : memref<2x32xf32, #tpu.memory_space<vmem>>, vector<1x4xf32>,
    %c7 = arith.constant 7 : index
    %c0_38 = arith.constant 0 : index
    %39 = vector.load %arg5[%c7, %c0_38] : memref<16x4xf32, #tpu.memory_space<vmem>>, vector<1x4xf32>
    %c0_39 = arith.constant 0 : index
    %c28 = arith.constant 28 : index
    %40 = vector.load %arg6[%c0_39, %c28] : memref<2x32xf32, #tpu.memory_space<vmem>>, vector<1x4xf32>
    tpu.vector_store %arg6[%c0_39, %c28], %39 {strides = array<i32>} : memref<2x32xf32, #tpu.memory_space<vmem>>, vector<1x4xf32>,
    %c8_40 = arith.constant 8 : index
    %c0_41 = arith.constant 0 : index
    %41 = vector.load %arg5[%c8_40, %c0_41] : memref<16x4xf32, #tpu.memory_space<vmem>>, vector<1x4xf32>
    %c1_42 = arith.constant 1 : index
    %c0_43 = arith.constant 0 : index
    %42 = vector.load %arg6[%c1_42, %c0_43] : memref<2x32xf32, #tpu.memory_space<vmem>>, vector<1x4xf32>
    tpu.vector_store %arg6[%c1_42, %c0_43], %41 {strides = array<i32>} : memref<2x32xf32, #tpu.memory_space<vmem>>, vector<1x4xf32>,
    %c9 = arith.constant 9 : index
    %c0_44 = arith.constant 0 : index
    %43 = vector.load %arg5[%c9, %c0_44] : memref<16x4xf32, #tpu.memory_space<vmem>>, vector<1x4xf32>
    %c1_45 = arith.constant 1 : index
    %c4_46 = arith.constant 4 : index
    %44 = vector.load %arg6[%c1_45, %c4_46] : memref<2x32xf32, #tpu.memory_space<vmem>>, vector<1x4xf32>
    tpu.vector_store %arg6[%c1_45, %c4_46], %43 {strides = array<i32>} : memref<2x32xf32, #tpu.memory_space<vmem>>, vector<1x4xf32>,
    %c10 = arith.constant 10 : index
    %c0_47 = arith.constant 0 : index
    %45 = vector.load %arg5[%c10, %c0_47] : memref<16x4xf32, #tpu.memory_space<vmem>>, vector<1x4xf32>
    %c1_48 = arith.constant 1 : index
    %c8_49 = arith.constant 8 : index
    %46 = vector.load %arg6[%c1_48, %c8_49] : memref<2x32xf32, #tpu.memory_space<vmem>>, vector<1x4xf32>
    tpu.vector_store %arg6[%c1_48, %c8_49], %45 {strides = array<i32>} : memref<2x32xf32, #tpu.memory_space<vmem>>, vector<1x4xf32>,
    %c11 = arith.constant 11 : index
    %c0_50 = arith.constant 0 : index
    %47 = vector.load %arg5[%c11, %c0_50] : memref<16x4xf32, #tpu.memory_space<vmem>>, vector<1x4xf32>
    %c1_51 = arith.constant 1 : index
    %c12_52 = arith.constant 12 : index
    %48 = vector.load %arg6[%c1_51, %c12_52] : memref<2x32xf32, #tpu.memory_space<vmem>>, vector<1x4xf32>
    tpu.vector_store %arg6[%c1_51, %c12_52], %47 {strides = array<i32>} : memref<2x32xf32, #tpu.memory_space<vmem>>, vector<1x4xf32>,
    %c12_53 = arith.constant 12 : index
    %c0_54 = arith.constant 0 : index
    %49 = vector.load %arg5[%c12_53, %c0_54] : memref<16x4xf32, #tpu.memory_space<vmem>>, vector<1x4xf32>
    %c1_55 = arith.constant 1 : index
    %c16_56 = arith.constant 16 : index
    %50 = vector.load %arg6[%c1_55, %c16_56] : memref<2x32xf32, #tpu.memory_space<vmem>>, vector<1x4xf32>
    tpu.vector_store %arg6[%c1_55, %c16_56], %49 {strides = array<i32>} : memref<2x32xf32, #tpu.memory_space<vmem>>, vector<1x4xf32>,
    %c13 = arith.constant 13 : index
    %c0_57 = arith.constant 0 : index
    %51 = vector.load %arg5[%c13, %c0_57] : memref<16x4xf32, #tpu.memory_space<vmem>>, vector<1x4xf32>
    %c1_58 = arith.constant 1 : index
    %c20_59 = arith.constant 20 : index
    %52 = vector.load %arg6[%c1_58, %c20_59] : memref<2x32xf32, #tpu.memory_space<vmem>>, vector<1x4xf32>
    tpu.vector_store %arg6[%c1_58, %c20_59], %51 {strides = array<i32>} : memref<2x32xf32, #tpu.memory_space<vmem>>, vector<1x4xf32>,
    %c14 = arith.constant 14 : index
    %c0_60 = arith.constant 0 : index
    %53 = vector.load %arg5[%c14, %c0_60] : memref<16x4xf32, #tpu.memory_space<vmem>>, vector<1x4xf32>
    %c1_61 = arith.constant 1 : index
    %c24_62 = arith.constant 24 : index
    %54 = vector.load %arg6[%c1_61, %c24_62] : memref<2x32xf32, #tpu.memory_space<vmem>>, vector<1x4xf32>
    tpu.vector_store %arg6[%c1_61, %c24_62], %53 {strides = array<i32>} : memref<2x32xf32, #tpu.memory_space<vmem>>, vector<1x4xf32>,
    %c15 = arith.constant 15 : index
    %c0_63 = arith.constant 0 : index
    %55 = vector.load %arg5[%c15, %c0_63] : memref<16x4xf32, #tpu.memory_space<vmem>>, vector<1x4xf32>
    %c1_64 = arith.constant 1 : index
    %c28_65 = arith.constant 28 : index
    %56 = vector.load %arg6[%c1_64, %c28_65] : memref<2x32xf32, #tpu.memory_space<vmem>>, vector<1x4xf32>
    tpu.vector_store %arg6[%c1_64, %c28_65], %55 {strides = array<i32>} : memref<2x32xf32, #tpu.memory_space<vmem>>, vector<1x4xf32>,
    %c0_66 = arith.constant 0 : index
    %c0_67 = arith.constant 0 : index
    %57 = vector.load %arg3[%c0_66, %c0_67] : memref<40x32xf32, #tpu.memory_space<vmem>>, vector<32x32xf32>
    %c0_68 = arith.constant 0 : index
    %c0_69 = arith.constant 0 : index
    %58 = vector.load %arg6[%c0_68, %c0_69] : memref<2x32xf32, #tpu.memory_space<vmem>>, vector<2x32xf32>
    %cst_70 = arith.constant dense<0.000000e+00> : vector<2x32xf32>
    %59 = tpu.matmul %58, %57, %cst_70 {dimension_numbers = #tpu.dot_dimension_numbers<[1], [0], [0], [1], [0, 0, 1, 1], [], []>} : vector<2x32xf32>, vector<32x32xf32>, vector<2x32xf32> -> vector<2x32xf32>
    %c35 = arith.constant 35 : index
    %c0_71 = arith.constant 0 : index
    %60 = vector.load %arg3[%c35, %c0_71] : memref<40x32xf32, #tpu.memory_space<vmem>>, vector<1x32xf32>
    %61 = vector.broadcast %60 : vector<1x32xf32> to vector<2x32xf32>
    %62 = arith.addf %59, %61 : vector<2x32xf32>
    %c0_72 = arith.constant 0 : index
    %c0_73 = arith.constant 0 : index
    %63 = vector.load %arg7[%c0_72, %c0_73] : memref<2x32xf32, #tpu.memory_space<vmem>>, vector<2x32xf32>
    tpu.vector_store %arg7[%c0_72, %c0_73], %62 {strides = array<i32>} : memref<2x32xf32, #tpu.memory_space<vmem>>, vector<2x32xf32>,
    %c0_74 = arith.constant 0 : index
    %c0_75 = arith.constant 0 : index
    %64 = vector.load %arg7[%c0_74, %c0_75] : memref<2x32xf32, #tpu.memory_space<vmem>>, vector<1x4xf32>
    %c0_76 = arith.constant 0 : index
    %c0_77 = arith.constant 0 : index
    %65 = vector.load %arg8[%c0_76, %c0_77] : memref<16x4xf32, #tpu.memory_space<vmem>>, vector<1x4xf32>
    tpu.vector_store %arg8[%c0_76, %c0_77], %64 {strides = array<i32>} : memref<16x4xf32, #tpu.memory_space<vmem>>, vector<1x4xf32>,
    %c0_78 = arith.constant 0 : index
    %c4_79 = arith.constant 4 : index
    %66 = vector.load %arg7[%c0_78, %c4_79] : memref<2x32xf32, #tpu.memory_space<vmem>>, vector<1x4xf32>
    %c1_80 = arith.constant 1 : index
    %c0_81 = arith.constant 0 : index
    %67 = vector.load %arg8[%c1_80, %c0_81] : memref<16x4xf32, #tpu.memory_space<vmem>>, vector<1x4xf32>
    tpu.vector_store %arg8[%c1_80, %c0_81], %66 {strides = array<i32>} : memref<16x4xf32, #tpu.memory_space<vmem>>, vector<1x4xf32>,
    %c0_82 = arith.constant 0 : index
    %c8_83 = arith.constant 8 : index
    %68 = vector.load %arg7[%c0_82, %c8_83] : memref<2x32xf32, #tpu.memory_space<vmem>>, vector<1x4xf32>
    %c2_84 = arith.constant 2 : index
    %c0_85 = arith.constant 0 : index
    %69 = vector.load %arg8[%c2_84, %c0_85] : memref<16x4xf32, #tpu.memory_space<vmem>>, vector<1x4xf32>
    tpu.vector_store %arg8[%c2_84, %c0_85], %68 {strides = array<i32>} : memref<16x4xf32, #tpu.memory_space<vmem>>, vector<1x4xf32>,
    %c0_86 = arith.constant 0 : index
    %c12_87 = arith.constant 12 : index
    %70 = vector.load %arg7[%c0_86, %c12_87] : memref<2x32xf32, #tpu.memory_space<vmem>>, vector<1x4xf32>
    %c3_88 = arith.constant 3 : index
    %c0_89 = arith.constant 0 : index
    %71 = vector.load %arg8[%c3_88, %c0_89] : memref<16x4xf32, #tpu.memory_space<vmem>>, vector<1x4xf32>
    tpu.vector_store %arg8[%c3_88, %c0_89], %70 {strides = array<i32>} : memref<16x4xf32, #tpu.memory_space<vmem>>, vector<1x4xf32>,
    %c0_90 = arith.constant 0 : index
    %c16_91 = arith.constant 16 : index
    %72 = vector.load %arg7[%c0_90, %c16_91] : memref<2x32xf32, #tpu.memory_space<vmem>>, vector<1x4xf32>
    %c4_92 = arith.constant 4 : index
    %c0_93 = arith.constant 0 : index
    %73 = vector.load %arg8[%c4_92, %c0_93] : memref<16x4xf32, #tpu.memory_space<vmem>>, vector<1x4xf32>
    tpu.vector_store %arg8[%c4_92, %c0_93], %72 {strides = array<i32>} : memref<16x4xf32, #tpu.memory_space<vmem>>, vector<1x4xf32>,
    %c0_94 = arith.constant 0 : index
    %c20_95 = arith.constant 20 : index
    %74 = vector.load %arg7[%c0_94, %c20_95] : memref<2x32xf32, #tpu.memory_space<vmem>>, vector<1x4xf32>
    %c5_96 = arith.constant 5 : index
    %c0_97 = arith.constant 0 : index
    %75 = vector.load %arg8[%c5_96, %c0_97] : memref<16x4xf32, #tpu.memory_space<vmem>>, vector<1x4xf32>
    tpu.vector_store %arg8[%c5_96, %c0_97], %74 {strides = array<i32>} : memref<16x4xf32, #tpu.memory_space<vmem>>, vector<1x4xf32>,
    %c0_98 = arith.constant 0 : index
    %c24_99 = arith.constant 24 : index
    %76 = vector.load %arg7[%c0_98, %c24_99] : memref<2x32xf32, #tpu.memory_space<vmem>>, vector<1x4xf32>
    %c6_100 = arith.constant 6 : index
    %c0_101 = arith.constant 0 : index
    %77 = vector.load %arg8[%c6_100, %c0_101] : memref<16x4xf32, #tpu.memory_space<vmem>>, vector<1x4xf32>
    tpu.vector_store %arg8[%c6_100, %c0_101], %76 {strides = array<i32>} : memref<16x4xf32, #tpu.memory_space<vmem>>, vector<1x4xf32>,
    %c0_102 = arith.constant 0 : index
    %c28_103 = arith.constant 28 : index
    %78 = vector.load %arg7[%c0_102, %c28_103] : memref<2x32xf32, #tpu.memory_space<vmem>>, vector<1x4xf32>
    %c7_104 = arith.constant 7 : index
    %c0_105 = arith.constant 0 : index
    %79 = vector.load %arg8[%c7_104, %c0_105] : memref<16x4xf32, #tpu.memory_space<vmem>>, vector<1x4xf32>
    tpu.vector_store %arg8[%c7_104, %c0_105], %78 {strides = array<i32>} : memref<16x4xf32, #tpu.memory_space<vmem>>, vector<1x4xf32>,
    %c1_106 = arith.constant 1 : index
    %c0_107 = arith.constant 0 : index
    %80 = vector.load %arg7[%c1_106, %c0_107] : memref<2x32xf32, #tpu.memory_space<vmem>>, vector<1x4xf32>
    %c8_108 = arith.constant 8 : index
    %c0_109 = arith.constant 0 : index
    %81 = vector.load %arg8[%c8_108, %c0_109] : memref<16x4xf32, #tpu.memory_space<vmem>>, vector<1x4xf32>
    tpu.vector_store %arg8[%c8_108, %c0_109], %80 {strides = array<i32>} : memref<16x4xf32, #tpu.memory_space<vmem>>, vector<1x4xf32>,
    %c1_110 = arith.constant 1 : index
    %c4_111 = arith.constant 4 : index
    %82 = vector.load %arg7[%c1_110, %c4_111] : memref<2x32xf32, #tpu.memory_space<vmem>>, vector<1x4xf32>
    %c9_112 = arith.constant 9 : index
    %c0_113 = arith.constant 0 : index
    %83 = vector.load %arg8[%c9_112, %c0_113] : memref<16x4xf32, #tpu.memory_space<vmem>>, vector<1x4xf32>
    tpu.vector_store %arg8[%c9_112, %c0_113], %82 {strides = array<i32>} : memref<16x4xf32, #tpu.memory_space<vmem>>, vector<1x4xf32>,
    %c1_114 = arith.constant 1 : index
    %c8_115 = arith.constant 8 : index
    %84 = vector.load %arg7[%c1_114, %c8_115] : memref<2x32xf32, #tpu.memory_space<vmem>>, vector<1x4xf32>
    %c10_116 = arith.constant 10 : index
    %c0_117 = arith.constant 0 : index
    %85 = vector.load %arg8[%c10_116, %c0_117] : memref<16x4xf32, #tpu.memory_space<vmem>>, vector<1x4xf32>
    tpu.vector_store %arg8[%c10_116, %c0_117], %84 {strides = array<i32>} : memref<16x4xf32, #tpu.memory_space<vmem>>, vector<1x4xf32>,
    %c1_118 = arith.constant 1 : index
    %c12_119 = arith.constant 12 : index
    %86 = vector.load %arg7[%c1_118, %c12_119] : memref<2x32xf32, #tpu.memory_space<vmem>>, vector<1x4xf32>
    %c11_120 = arith.constant 11 : index
    %c0_121 = arith.constant 0 : index
    %87 = vector.load %arg8[%c11_120, %c0_121] : memref<16x4xf32, #tpu.memory_space<vmem>>, vector<1x4xf32>
    tpu.vector_store %arg8[%c11_120, %c0_121], %86 {strides = array<i32>} : memref<16x4xf32, #tpu.memory_space<vmem>>, vector<1x4xf32>,
    %c1_122 = arith.constant 1 : index
    %c16_123 = arith.constant 16 : index
    %88 = vector.load %arg7[%c1_122, %c16_123] : memref<2x32xf32, #tpu.memory_space<vmem>>, vector<1x4xf32>
    %c12_124 = arith.constant 12 : index
    %c0_125 = arith.constant 0 : index
    %89 = vector.load %arg8[%c12_124, %c0_125] : memref<16x4xf32, #tpu.memory_space<vmem>>, vector<1x4xf32>
    tpu.vector_store %arg8[%c12_124, %c0_125], %88 {strides = array<i32>} : memref<16x4xf32, #tpu.memory_space<vmem>>, vector<1x4xf32>,
    %c1_126 = arith.constant 1 : index
    %c20_127 = arith.constant 20 : index
    %90 = vector.load %arg7[%c1_126, %c20_127] : memref<2x32xf32, #tpu.memory_space<vmem>>, vector<1x4xf32>
    %c13_128 = arith.constant 13 : index
    %c0_129 = arith.constant 0 : index
    %91 = vector.load %arg8[%c13_128, %c0_129] : memref<16x4xf32, #tpu.memory_space<vmem>>, vector<1x4xf32>
    tpu.vector_store %arg8[%c13_128, %c0_129], %90 {strides = array<i32>} : memref<16x4xf32, #tpu.memory_space<vmem>>, vector<1x4xf32>,
    %c1_130 = arith.constant 1 : index
    %c24_131 = arith.constant 24 : index
    %92 = vector.load %arg7[%c1_130, %c24_131] : memref<2x32xf32, #tpu.memory_space<vmem>>, vector<1x4xf32>
    %c14_132 = arith.constant 14 : index
    %c0_133 = arith.constant 0 : index
    %93 = vector.load %arg8[%c14_132, %c0_133] : memref<16x4xf32, #tpu.memory_space<vmem>>, vector<1x4xf32>
    tpu.vector_store %arg8[%c14_132, %c0_133], %92 {strides = array<i32>} : memref<16x4xf32, #tpu.memory_space<vmem>>, vector<1x4xf32>,
    %c1_134 = arith.constant 1 : index
    %c28_135 = arith.constant 28 : index
    %94 = vector.load %arg7[%c1_134, %c28_135] : memref<2x32xf32, #tpu.memory_space<vmem>>, vector<1x4xf32>
    %c15_136 = arith.constant 15 : index
    %c0_137 = arith.constant 0 : index
    %95 = vector.load %arg8[%c15_136, %c0_137] : memref<16x4xf32, #tpu.memory_space<vmem>>, vector<1x4xf32>
    tpu.vector_store %arg8[%c15_136, %c0_137], %94 {strides = array<i32>} : memref<16x4xf32, #tpu.memory_space<vmem>>, vector<1x4xf32>,
    %c0_138 = arith.constant 0 : index
    %c0_139 = arith.constant 0 : index
    %96 = vector.load %arg8[%c0_138, %c0_139] : memref<16x4xf32, #tpu.memory_space<vmem>>, vector<16x4xf32>
    %c0_140 = arith.constant 0 : index
    %c48 = arith.constant 48 : index
    %97 = vector.load %arg2[%c0_140, %c48] : memref<16x96xf32, #tpu.memory_space<vmem>>, vector<4x8xf32>
    %cst_141 = arith.constant dense<0.000000e+00> : vector<16x8xf32>
    %98 = tpu.matmul %96, %97, %cst_141 {dimension_numbers = #tpu.dot_dimension_numbers<[1], [0], [0], [1], [0, 0, 1, 1], [], []>} : vector<16x4xf32>, vector<4x8xf32>, vector<16x8xf32> -> vector<16x8xf32>
    %cst_142 = arith.constant dense<0.000000e+00> : vector<16x8xf32>
    %99 = tpu.matmul %0, %98, %cst_142 {dimension_numbers = #tpu.dot_dimension_numbers<[1], [0], [0], [1], [0, 0, 1, 1], [], []>} : vector<16x16xf32>, vector<16x8xf32>, vector<16x8xf32> -> vector<16x8xf32>
    %c36 = arith.constant 36 : index
    %c0_143 = arith.constant 0 : index
    %100 = vector.load %arg3[%c36, %c0_143] : memref<40x32xf32, #tpu.memory_space<vmem>>, vector<1x8xf32>
    %101 = vector.broadcast %100 : vector<1x8xf32> to vector<16x8xf32>
    %102 = arith.addf %99, %101 : vector<16x8xf32>
    %cst_144 = arith.constant 0.000000e+00 : f32
    %103 = vector.broadcast %cst_144 : f32 to vector<16x8xf32>
    %104 = arith.maximumf %102, %103 : vector<16x8xf32>
    %c0_145 = arith.constant 0 : index
    %c64 = arith.constant 64 : index
    %105 = vector.load %arg2[%c0_145, %c64] : memref<16x96xf32, #tpu.memory_space<vmem>>, vector<8x16xf32>
    %cst_146 = arith.constant dense<0.000000e+00> : vector<16x16xf32>
    %106 = tpu.matmul %104, %105, %cst_146 {dimension_numbers = #tpu.dot_dimension_numbers<[1], [0], [0], [1], [0, 0, 1, 1], [], []>} : vector<16x8xf32>, vector<8x16xf32>, vector<16x16xf32> -> vector<16x16xf32>
    %cst_147 = arith.constant dense<0.000000e+00> : vector<16x16xf32>
    %107 = tpu.matmul %0, %106, %cst_147 {dimension_numbers = #tpu.dot_dimension_numbers<[1], [0], [0], [1], [0, 0, 1, 1], [], []>} : vector<16x16xf32>, vector<16x16xf32>, vector<16x16xf32> -> vector<16x16xf32>
    %c37 = arith.constant 37 : index
    %c0_148 = arith.constant 0 : index
    %108 = vector.load %arg3[%c37, %c0_148] : memref<40x32xf32, #tpu.memory_space<vmem>>, vector<1x16xf32>
    %109 = vector.broadcast %108 : vector<1x16xf32> to vector<16x16xf32>
    %110 = arith.addf %107, %109 : vector<16x16xf32>
    %cst_149 = arith.constant 0.000000e+00 : f32
    %111 = vector.broadcast %cst_149 : f32 to vector<16x16xf32>
    %112 = arith.maximumf %110, %111 : vector<16x16xf32>
    %c0_150 = arith.constant 0 : index
    %c80 = arith.constant 80 : index
    %113 = vector.load %arg2[%c0_150, %c80] : memref<16x96xf32, #tpu.memory_space<vmem>>, vector<16x1xf32>
    %cst_151 = arith.constant dense<0.000000e+00> : vector<16x1xf32>
    %114 = tpu.matmul %112, %113, %cst_151 {dimension_numbers = #tpu.dot_dimension_numbers<[1], [0], [0], [1], [0, 0, 1, 1], [], []>} : vector<16x16xf32>, vector<16x1xf32>, vector<16x1xf32> -> vector<16x1xf32>
    %cst_152 = arith.constant dense<0.000000e+00> : vector<16x1xf32>
    %115 = tpu.matmul %0, %114, %cst_152 {dimension_numbers = #tpu.dot_dimension_numbers<[1], [0], [0], [1], [0, 0, 1, 1], [], []>} : vector<16x16xf32>, vector<16x1xf32>, vector<16x1xf32> -> vector<16x1xf32>
    %c38 = arith.constant 38 : index
    %c0_153 = arith.constant 0 : index
    %116 = vector.load %arg3[%c38, %c0_153] : memref<40x32xf32, #tpu.memory_space<vmem>>, vector<1x1xf32>
    %117 = vector.broadcast %116 : vector<1x1xf32> to vector<16x1xf32>
    %118 = arith.addf %115, %117 : vector<16x1xf32>
    %cst_154 = arith.constant 0.000000e+00 : f32
    %119 = vector.broadcast %cst_154 : f32 to vector<16x1xf32>
    %120 = arith.maximumf %118, %119 : vector<16x1xf32>
    %c0_155 = arith.constant 0 : index
    %c0_156 = arith.constant 0 : index
    %121 = vector.load %arg9[%c0_155, %c0_156] : memref<16x1xf32, #tpu.memory_space<vmem>>, vector<16x1xf32>
    tpu.vector_store %arg9[%c0_155, %c0_156], %120 {strides = array<i32>} : memref<16x1xf32, #tpu.memory_space<vmem>>, vector<16x1xf32>,
    %c0_157 = arith.constant 0 : index
    %c0_158 = arith.constant 0 : index
    %122 = vector.load %arg9[%c0_157, %c0_158] : memref<16x1xf32, #tpu.memory_space<vmem>>, vector<1x1xf32>
    %c0_159 = arith.constant 0 : index
    %c0_160 = arith.constant 0 : index
    %123 = vector.load %arg4[%c0_159, %c0_160] : memref<2x8xf32, #tpu.memory_space<vmem>>, vector<1x1xf32>
    tpu.vector_store %arg4[%c0_159, %c0_160], %122 {strides = array<i32>} : memref<2x8xf32, #tpu.memory_space<vmem>>, vector<1x1xf32>,
    %c1_161 = arith.constant 1 : index
    %c0_162 = arith.constant 0 : index
    %124 = vector.load %arg9[%c1_161, %c0_162] : memref<16x1xf32, #tpu.memory_space<vmem>>, vector<1x1xf32>
    %c0_163 = arith.constant 0 : index
    %c1_164 = arith.constant 1 : index
    %125 = vector.load %arg4[%c0_163, %c1_164] : memref<2x8xf32, #tpu.memory_space<vmem>>, vector<1x1xf32>
    tpu.vector_store %arg4[%c0_163, %c1_164], %124 {strides = array<i32>} : memref<2x8xf32, #tpu.memory_space<vmem>>, vector<1x1xf32>,
    %c2_165 = arith.constant 2 : index
    %c0_166 = arith.constant 0 : index
    %126 = vector.load %arg9[%c2_165, %c0_166] : memref<16x1xf32, #tpu.memory_space<vmem>>, vector<1x1xf32>
    %c0_167 = arith.constant 0 : index
    %c2_168 = arith.constant 2 : index
    %127 = vector.load %arg4[%c0_167, %c2_168] : memref<2x8xf32, #tpu.memory_space<vmem>>, vector<1x1xf32>
    tpu.vector_store %arg4[%c0_167, %c2_168], %126 {strides = array<i32>} : memref<2x8xf32, #tpu.memory_space<vmem>>, vector<1x1xf32>,
    %c3_169 = arith.constant 3 : index
    %c0_170 = arith.constant 0 : index
    %128 = vector.load %arg9[%c3_169, %c0_170] : memref<16x1xf32, #tpu.memory_space<vmem>>, vector<1x1xf32>
    %c0_171 = arith.constant 0 : index
    %c3_172 = arith.constant 3 : index
    %129 = vector.load %arg4[%c0_171, %c3_172] : memref<2x8xf32, #tpu.memory_space<vmem>>, vector<1x1xf32>
    tpu.vector_store %arg4[%c0_171, %c3_172], %128 {strides = array<i32>} : memref<2x8xf32, #tpu.memory_space<vmem>>, vector<1x1xf32>,
    %c4_173 = arith.constant 4 : index
    %c0_174 = arith.constant 0 : index
    %130 = vector.load %arg9[%c4_173, %c0_174] : memref<16x1xf32, #tpu.memory_space<vmem>>, vector<1x1xf32>
    %c0_175 = arith.constant 0 : index
    %c4_176 = arith.constant 4 : index
    %131 = vector.load %arg4[%c0_175, %c4_176] : memref<2x8xf32, #tpu.memory_space<vmem>>, vector<1x1xf32>
    tpu.vector_store %arg4[%c0_175, %c4_176], %130 {strides = array<i32>} : memref<2x8xf32, #tpu.memory_space<vmem>>, vector<1x1xf32>,
    %c5_177 = arith.constant 5 : index
    %c0_178 = arith.constant 0 : index
    %132 = vector.load %arg9[%c5_177, %c0_178] : memref<16x1xf32, #tpu.memory_space<vmem>>, vector<1x1xf32>
    %c0_179 = arith.constant 0 : index
    %c5_180 = arith.constant 5 : index
    %133 = vector.load %arg4[%c0_179, %c5_180] : memref<2x8xf32, #tpu.memory_space<vmem>>, vector<1x1xf32>
    tpu.vector_store %arg4[%c0_179, %c5_180], %132 {strides = array<i32>} : memref<2x8xf32, #tpu.memory_space<vmem>>, vector<1x1xf32>,
    %c6_181 = arith.constant 6 : index
    %c0_182 = arith.constant 0 : index
    %134 = vector.load %arg9[%c6_181, %c0_182] : memref<16x1xf32, #tpu.memory_space<vmem>>, vector<1x1xf32>
    %c0_183 = arith.constant 0 : index
    %c6_184 = arith.constant 6 : index
    %135 = vector.load %arg4[%c0_183, %c6_184] : memref<2x8xf32, #tpu.memory_space<vmem>>, vector<1x1xf32>
    tpu.vector_store %arg4[%c0_183, %c6_184], %134 {strides = array<i32>} : memref<2x8xf32, #tpu.memory_space<vmem>>, vector<1x1xf32>,
    %c7_185 = arith.constant 7 : index
    %c0_186 = arith.constant 0 : index
    %136 = vector.load %arg9[%c7_185, %c0_186] : memref<16x1xf32, #tpu.memory_space<vmem>>, vector<1x1xf32>
    %c0_187 = arith.constant 0 : index
    %c7_188 = arith.constant 7 : index
    %137 = vector.load %arg4[%c0_187, %c7_188] : memref<2x8xf32, #tpu.memory_space<vmem>>, vector<1x1xf32>
    tpu.vector_store %arg4[%c0_187, %c7_188], %136 {strides = array<i32>} : memref<2x8xf32, #tpu.memory_space<vmem>>, vector<1x1xf32>,
    %c8_189 = arith.constant 8 : index
    %c0_190 = arith.constant 0 : index
    %138 = vector.load %arg9[%c8_189, %c0_190] : memref<16x1xf32, #tpu.memory_space<vmem>>, vector<1x1xf32>
    %c1_191 = arith.constant 1 : index
    %c0_192 = arith.constant 0 : index
    %139 = vector.load %arg4[%c1_191, %c0_192] : memref<2x8xf32, #tpu.memory_space<vmem>>, vector<1x1xf32>
    tpu.vector_store %arg4[%c1_191, %c0_192], %138 {strides = array<i32>} : memref<2x8xf32, #tpu.memory_space<vmem>>, vector<1x1xf32>,
    %c9_193 = arith.constant 9 : index
    %c0_194 = arith.constant 0 : index
    %140 = vector.load %arg9[%c9_193, %c0_194] : memref<16x1xf32, #tpu.memory_space<vmem>>, vector<1x1xf32>
    %c1_195 = arith.constant 1 : index
    %c1_196 = arith.constant 1 : index
    %141 = vector.load %arg4[%c1_195, %c1_196] : memref<2x8xf32, #tpu.memory_space<vmem>>, vector<1x1xf32>
    tpu.vector_store %arg4[%c1_195, %c1_196], %140 {strides = array<i32>} : memref<2x8xf32, #tpu.memory_space<vmem>>, vector<1x1xf32>,
    %c10_197 = arith.constant 10 : index
    %c0_198 = arith.constant 0 : index
    %142 = vector.load %arg9[%c10_197, %c0_198] : memref<16x1xf32, #tpu.memory_space<vmem>>, vector<1x1xf32>
    %c1_199 = arith.constant 1 : index
    %c2_200 = arith.constant 2 : index
    %143 = vector.load %arg4[%c1_199, %c2_200] : memref<2x8xf32, #tpu.memory_space<vmem>>, vector<1x1xf32>
    tpu.vector_store %arg4[%c1_199, %c2_200], %142 {strides = array<i32>} : memref<2x8xf32, #tpu.memory_space<vmem>>, vector<1x1xf32>,
    %c11_201 = arith.constant 11 : index
    %c0_202 = arith.constant 0 : index
    %144 = vector.load %arg9[%c11_201, %c0_202] : memref<16x1xf32, #tpu.memory_space<vmem>>, vector<1x1xf32>
    %c1_203 = arith.constant 1 : index
    %c3_204 = arith.constant 3 : index
    %145 = vector.load %arg4[%c1_203, %c3_204] : memref<2x8xf32, #tpu.memory_space<vmem>>, vector<1x1xf32>
    tpu.vector_store %arg4[%c1_203, %c3_204], %144 {strides = array<i32>} : memref<2x8xf32, #tpu.memory_space<vmem>>, vector<1x1xf32>,
    %c12_205 = arith.constant 12 : index
    %c0_206 = arith.constant 0 : index
    %146 = vector.load %arg9[%c12_205, %c0_206] : memref<16x1xf32, #tpu.memory_space<vmem>>, vector<1x1xf32>
    %c1_207 = arith.constant 1 : index
    %c4_208 = arith.constant 4 : index
    %147 = vector.load %arg4[%c1_207, %c4_208] : memref<2x8xf32, #tpu.memory_space<vmem>>, vector<1x1xf32>
    tpu.vector_store %arg4[%c1_207, %c4_208], %146 {strides = array<i32>} : memref<2x8xf32, #tpu.memory_space<vmem>>, vector<1x1xf32>,
    %c13_209 = arith.constant 13 : index
    %c0_210 = arith.constant 0 : index
    %148 = vector.load %arg9[%c13_209, %c0_210] : memref<16x1xf32, #tpu.memory_space<vmem>>, vector<1x1xf32>
    %c1_211 = arith.constant 1 : index
    %c5_212 = arith.constant 5 : index
    %149 = vector.load %arg4[%c1_211, %c5_212] : memref<2x8xf32, #tpu.memory_space<vmem>>, vector<1x1xf32>
    tpu.vector_store %arg4[%c1_211, %c5_212], %148 {strides = array<i32>} : memref<2x8xf32, #tpu.memory_space<vmem>>, vector<1x1xf32>,
    %c14_213 = arith.constant 14 : index
    %c0_214 = arith.constant 0 : index
    %150 = vector.load %arg9[%c14_213, %c0_214] : memref<16x1xf32, #tpu.memory_space<vmem>>, vector<1x1xf32>
    %c1_215 = arith.constant 1 : index
    %c6_216 = arith.constant 6 : index
    %151 = vector.load %arg4[%c1_215, %c6_216] : memref<2x8xf32, #tpu.memory_space<vmem>>, vector<1x1xf32>
    tpu.vector_store %arg4[%c1_215, %c6_216], %150 {strides = array<i32>} : memref<2x8xf32, #tpu.memory_space<vmem>>, vector<1x1xf32>,
    %c15_217 = arith.constant 15 : index
    %c0_218 = arith.constant 0 : index
    %152 = vector.load %arg9[%c15_217, %c0_218] : memref<16x1xf32, #tpu.memory_space<vmem>>, vector<1x1xf32>
    %c1_219 = arith.constant 1 : index
    %c7_220 = arith.constant 7 : index
    %153 = vector.load %arg4[%c1_219, %c7_220] : memref<2x8xf32, #tpu.memory_space<vmem>>, vector<1x1xf32>
    tpu.vector_store %arg4[%c1_219, %c7_220], %152 {strides = array<i32>} : memref<2x8xf32, #tpu.memory_space<vmem>>, vector<1x1xf32>,
    return
  }
}

</mosaic_0001>

<bundles_post_ra>
// kernel: forward.1
= control target key start
LH: loop header
LB: loop body
LE: loop exit
PB: predicated region body
PF: predicated region fallthrough
CT: control target
= control target key end

     0   :  { %vm30_vm0 = vcmask 1043456   ;;  %vm23_vm1 = vcmask 31744   ;;  %s1913_s0 = inlined_call_operand.vmem [shape: f32[16,16], index: 0, kind: input, shape index: {}]   ;;  %s1914_s1 = inlined_call_operand.vmem [shape: f32[16,4], index: 1, kind: input, shape index: {}]   ;;  %s1915_s2 = inlined_call_operand.vmem [shape: f32[16,96], index: 2, kind: input, shape index: {}]   ;;  %s1916_s3 = inlined_call_operand.vmem [shape: f32[40,32], index: 3, kind: input, shape index: {}]   ;;  %s1917_s4 = inlined_call_operand.hbm [shape: f32[2,8], index: 4, kind: output, shape index: {}]  }
   0x1   :  { %v22_v0 = vld [vmem:[%s1915_s2] sm:$0xf]  ;;  %v21_v2 = vld [vmem:[%s1914_s1 + $0x8] sm:$0xff] }
   0x2   :  { %v20_v1 = vld [vmem:[%s1914_s1] sm:$0xff]  ;;  %1518 = vmatprep.subr.msk.mxu0 %vm30_vm0, %v22_v0 }
   0x3   :  { %1520 = vmatprep.mubr.msk.f32.mxu0 %vm23_vm1, %v20_v1 }
   0x4   :  { %9 = vsyncpa [#allocation8], 0  ;;  %1519 = vmatpush3.msk.msra.mxu0 %vm30_vm0, %v22_v0  ;;  %v1774_v3 = vld [vmem:[%s1913_s0] sm:$0xff]  ;;  %vm114_vm2 = vcmask 130048   ;;  %v199_v5 = vld [vmem:[%s1915_s2 + $0x8] sm:$0xff]  ;;  %s1705_s26 = smov 112  }
   0x5   :  { %1521 = vmatmul.mubr.msk.f32.vlgmr.msra.gmra.mrb[0].mxu0 %vm23_vm1, %v21_v2  ;;  %1527 = vmatprep.mubr.msk.f32.mxu1 %vm114_vm2, %v1774_v3  ;;  %v1781_v4 = vld [vmem:[%s1915_s2] sm:$0xff]  ;;  %v1794_v14 = vld [vmem:[%s1913_s0 + $0x8] sm:$0xff]  ;;  %s1706_s0 = smov 96   ;;  %vm376_vm3 = vcmask 64512   ;;  %s1707_s9 = smov 4   ;;  %vm541_vm4 = vcmask 24576  }
   0x6   :  { %v1787_v6 = vpack.i.bf16 %v199_v5, %v1781_v4  ;;  %v1438_v15 = vld [vmem:[%s1916_s3 + $0x20] ss:$0 sm:$0xff]  ;;  %v1443_v26 = vld [vmem:[%s1916_s3 + $0x21] ss:$0 sm:$0xff]  ;;  %v1448_v36 = vld [vmem:[%s1916_s3 + $0x22] ss:$0 sm:$0xff] }
   0x7   :  { %s1708_s10 = smov 8   ;;  %s1709_s11 = smov 12   ;;  %v636_v52 = vld [vmem:[%s1916_s3] sm:$0xff]  ;;  %v637_v53 = vld [vmem:[%s1916_s3 + $0x8] sm:$0xff]  ;;  %v638_v54 = vld [vmem:[%s1916_s3 + $0x10] sm:$0xff]  ;;  %v1712_v56 = vmov 0.0|0.0  }
   0x8   :  { %1672 = vrot.lane.b32.xlu0 %v1787_v6, %s1705_s26  ;;  %s1710_s12 = smov 16   ;;  %s1711_s13 = smov 20   ;;  %v1622_v57 = vpack.c.bf16 %v637_v53, %v636_v52  ;;  %v639_v58 = vld [vmem:[%s1916_s3 + $0x18] sm:$0xff]  ;;  %vm1714_vm5 = vmmov 0   ;;  %v1715_v59 = vmov 0.0   ;;  %vm548_vm6 = vcmask 57376  }
   0x9   :  { %s1713_s22 = smov 24   ;;  %v1625_v60 = vpack.c.bf16 %v639_v58, %v638_v54  ;;  %s1716_s23 = smov 28   ;;  %vm555_vm7 = vcmask 90176   ;;  %vm562_vm8 = vcmask 122976   ;;  %vm569_vm9 = vcmask 155776  }
   0xa   :  { %vm576_vm10 = vcmask 188576   ;;  %vm583_vm11 = vcmask 221376   ;;  %vm590_vm12 = vcmask 254176   ;;  %vm646_vm13 = vcmask 261120   ;;  %s1717_s25 = smov 120   ;;  %s1718_s27 = smov 124  }
   0xb   :  { %vm720_vm14 = vcmask 254976   ;;  %s1719_s28 = smov 116   ;;  %s1720_s29 = smov 104   ;;  %vm1322_vm15 = vcmask 7168  }
   0xc   :  { %373 = vrot.lane.b32.xlu0 %v1781_v4, %s1706_s0  ;;  %s1721_s30 = smov 108   ;;  %s1722_s0 = smov 100  }
   0xd   :  { %s1723_s7 = smov 80   ;;  %s1726_s15 = smov 1  }
   0xe   :  { %s1727_s16 = smov 2   ;;  %s1729_s17 = smov 5  }
   0xf   :  { %s1730_s18 = smov 6   ;;  %s1731_s19 = smov 7  }
  0x7a   :  { %v1673_v7 = vpop.permute.xlu0 %1672 }
  0x7b   :  { %v1675_v8 = vunpack.i.h.bf16 %v1673_v7  ;;  %v1674_v9 = vunpack.i.l.bf16 %v1673_v7 }
  0x7d   :  { %v1609_v11 = vpack.c.bf16 %v1675_v8, %v1674_v9 }
  0x7e   :  { %v374_v25 = vpop.permute.xlu0 %373 }
  0x7f   :  { %1610 = vmatprep.subr.bf16.mxu0 %v1609_v11 }
  0x80   :  { %1612 = vmatpush3.bf16.msra.mxu0 %v1609_v11 }
  0x81   :  { %1544 = vmatprep.subr.mxu0 %v374_v25 }
  0xd8   :  { %v1522_v10 = vpop.f32.mrb[0].mxu0 }
  0xd9   :  { %v100_v12 = vpop.f32.mrb[1].mxu0 }
  0xda   :  { %v1605_v13 = vpack.c.bf16 %v1522_v10, %v100_v12 }
  0xdc   :  { %1606 = vmatprep.subr.bf16.mxu1 %v1605_v13 }
  0xdd   :  { %1608 = vmatpush3.bf16.msra.mxu1 %v1605_v13 }
  0xe0   :  { %1528 = vmatmul.mubr.msk.f32.vlgmr.msra.gmra.mrb[0].mxu1 %vm114_vm2, %v1794_v14 }
  0xe1   :  { %1541 = vmatprep.mubr.msk.f32.mxu1 %vm114_vm2, %v1774_v3 }
 0x1b3   :  { %v1529_v16 = vpop.f32.mrb[0].mxu1 }
 0x1b4   :  { %v193_v17 = vadd.f32 %v1529_v16, %v1438_v15  ;;  %v187_v18 = vpop.f32.mrb[1].mxu1 }
 0x1b5   :  { %v188_v19 = vadd.f32 %v1438_v15, %v187_v18 }
 0x1b6   :  { %v197_v21 = vmax.f32 %v193_v17, 0.0 }
 0x1b7   :  { %v196_v20 = vmax.f32 %v188_v19, 0.0 }
 0x1b9   :  { %1534 = vmatprep.mubr.msk.f32.mxu0 %vm114_vm2, %v196_v20  ;;  %v1451_v20 = vld [vmem:[%s1916_s3 + $0x23] ss:$0 sm:$0xff] }
 0x1ba   :  { %1535 = vmatmul.mubr.msk.f32.vlgmr.msra.gmra.mrb[2].mxu0 %vm114_vm2, %v197_v21 }
 0x1bb   :  { %1545 = vmatpush3.msra.mxu0 %v374_v25 }
 0x1bc   :  { %1621 = vmatprep.subr.bf16.mxu0 %v1712_v56 }
 0x28d   :  { %v1536_v22 = vpop.f32.mrb[2].mxu0 }
 0x28e   :  { %v280_v23 = vpop.f32.mrb[3].mxu0 }
 0x28f   :  { %v1613_v24 = vpack.c.bf16 %v1536_v22, %v280_v23 }
 0x291   :  { %1614 = vmatprep.subr.bf16.mxu1 %v1613_v24 }
 0x292   :  { %1616 = vmatpush3.bf16.msra.mxu1 %v1613_v24 }
 0x295   :  { %1542 = vmatmul.mubr.msk.f32.vlgmr.msra.gmra.mrb[2].mxu1 %vm114_vm2, %v1794_v14 }
 0x296   :  { %1553 = vmatprep.mubr.msk.f32.mxu1 %vm114_vm2, %v1774_v3 }
 0x368   :  { %v1543_v27 = vpop.f32.mrb[2].mxu1 }
 0x369   :  { %v366_v28 = vadd.f32 %v1543_v27, %v1443_v26  ;;  %v360_v29 = vpop.f32.mrb[3].mxu1 }
 0x36a   :  { %v361_v30 = vadd.f32 %v1443_v26, %v360_v29 }
 0x36b   :  { %v370_v32 = vmax.f32 %v366_v28, 0.0 }
 0x36c   :  { %v369_v31 = vmax.f32 %v361_v30, 0.0 }
 0x36e   :  { %1546 = vmatprep.mubr.msk.f32.mxu0 %vm376_vm3, %v369_v31 }
 0x36f   :  { %1547 = vmatmul.mubr.msk.f32.vlgmr.msra.gmra.mrb[4].mxu0 %vm376_vm3, %v370_v32 }
 0x370   :  { %1564 = vmatprep.mubr.msk.f32.mxu0 %vm1714_vm5, %v1715_v59  ;;  %1623 = vmatpush3.bf16.msra.mxu0 %v1622_v57  ;;  %vm1361_vm5 = vcmask 41000  }
 0x371   :  { %1624 = vmatprep.subr.bf16.mxu0 %v1712_v56 }
 0x374   :  { %1626 = vmatpush3.bf16.msra.mxu0 %v1625_v60 }
 0x442   :  { %v1548_v33 = vpop.f32.mrb[4].mxu0 }
 0x443   :  { %v449_v34 = vpop.f32.mrb[5].mxu0 }
 0x444   :  { %v1617_v35 = vpack.c.bf16 %v1548_v33, %v449_v34 }
 0x446   :  { %1618 = vmatprep.subr.bf16.mxu1 %v1617_v35 }
 0x447   :  { %1620 = vmatpush3.bf16.msra.mxu1 %v1617_v35 }
 0x44a   :  { %1554 = vmatmul.mubr.msk.f32.vlgmr.msra.gmra.mrb[4].mxu1 %vm114_vm2, %v1794_v14 }
 0x51d   :  { %v1555_v37 = vpop.f32.mrb[4].mxu1 }
 0x51e   :  { %v535_v38 = vadd.f32 %v1555_v37, %v1448_v36  ;;  %v529_v39 = vpop.f32.mrb[5].mxu1 }
 0x51f   :  { %v530_v40 = vadd.f32 %v1448_v36, %v529_v39 }
 0x520   :  { %539 = vst.msk [vmem:[#allocation2 + $0x8] sm:$0xff] %vm23_vm1, %v535_v38 }
 0x521   :  { %538 = vst.msk [vmem:[#allocation2] sm:$0xff] %vm23_vm1, %v530_v40  ;;  %v812_v40 = vld [vmem:[%s1915_s2] sm:$0xf]  ;;  %s1724_s2 = smov 64  }
 0x527   :  { %v594_v41 = vld [vmem:[#allocation2 + $0x9] sm:$0x1]  ;;  %v600_v43 = vld [vmem:[#allocation2 + $0xa] sm:$0x1]  ;;  %v592_v44 = vld [vmem:[#allocation2 + $0x8] sm:$0x1] }
 0x528   :  { %596 = vrot.lane.b32.xlu1 %v594_v41, %s1707_s9  ;;  %v550_v42 = vld [vmem:[#allocation2 + $0x2] sm:$0x1]  ;;  %v557_v45 = vld [vmem:[#allocation2 + $0x3] sm:$0x1]  ;;  %593 = vst.msk [vmem:[#allocation3 + $0x1] sm:$0x1] %vm541_vm4, %v592_v44 }
 0x529   :  { %552 = vrot.lane.b32.xlu0 %v550_v42, %s1708_s10  ;;  %v540_v46 = vld [vmem:[#allocation2] sm:$0x1]  ;;  %v606_v47 = vld [vmem:[#allocation2 + $0xb] sm:$0x1]  ;;  %v564_v48 = vld [vmem:[#allocation2 + $0x4] sm:$0x1] }
 0x52a   :  { %542 = vst.msk [vmem:[#allocation3] sm:$0x1] %vm541_vm4, %v540_v46  ;;  %v612_v49 = vld [vmem:[#allocation2 + $0xc] sm:$0x1]  ;;  %v571_v50 = vld [vmem:[#allocation2 + $0x5] sm:$0x1] }
 0x52b   :  { %v618_v51 = vld [vmem:[#allocation2 + $0xd] sm:$0x1]  ;;  %v578_v55 = vld [vmem:[#allocation2 + $0x6] sm:$0x1]  ;;  %v543_v61 = vld [vmem:[#allocation2 + $0x1] sm:$0x1] }
 0x52c   :  { %602 = vrot.lane.b32.xlu1 %v600_v43, %s1708_s10  ;;  %v585_v62 = vld [vmem:[#allocation2 + $0x7] sm:$0x1]  ;;  %v624_v63 = vld [vmem:[#allocation2 + $0xe] sm:$0x1]  ;;  %v630_v0 = vld [vmem:[#allocation2 + $0xf] sm:$0x1] }
 0x52d   :  { %559 = vrot.lane.b32.xlu0 %v557_v45, %s1709_s11  ;;  %s1725_s10 = smov 48  }
 0x530   :  { %608 = vrot.lane.b32.xlu1 %v606_v47, %s1709_s11 }
 0x531   :  { %566 = vrot.lane.b32.xlu0 %v564_v48, %s1710_s12 }
 0x534   :  { %614 = vrot.lane.b32.xlu1 %v612_v49, %s1710_s12 }
 0x535   :  { %573 = vrot.lane.b32.xlu0 %v571_v50, %s1711_s13 }
 0x538   :  { %620 = vrot.lane.b32.xlu1 %v618_v51, %s1711_s13 }
 0x539   :  { %580 = vrot.lane.b32.xlu0 %v578_v55, %s1713_s22 }
 0x53c   :  { %545 = vrot.lane.b32.xlu1 %v543_v61, %s1707_s9 }
 0x53d   :  { %587 = vrot.lane.b32.xlu0 %v585_v62, %s1716_s23  ;;  %v1456_v62 = vld [vmem:[%s1916_s3 + $0x24] ss:$0 sm:$0xff] }
 0x540   :  { %626 = vrot.lane.b32.xlu1 %v624_v63, %s1713_s22 }
 0x544   :  { %632 = vrot.lane.b32.xlu1 %v630_v0, %s1716_s23 }
 0x59a   :  { %v597_v1 = vpop.permute.xlu1 %596 }
 0x59b   :  { %599 = vst.msk [vmem:[#allocation3 + $0x1] sm:$0x1] %vm548_vm6, %v597_v1  ;;  %v553_v2 = vpop.permute.xlu0 %552 }
 0x59e   :  { %v603_v5 = vpop.permute.xlu1 %602 }
 0x59f   :  { %605 = vst.msk [vmem:[#allocation3 + $0x1] sm:$0x1] %vm555_vm7, %v603_v5  ;;  %v560_v7 = vpop.permute.xlu0 %559 }
 0x5a2   :  { %v609_v8 = vpop.permute.xlu1 %608 }
 0x5a3   :  { %611 = vst.msk [vmem:[#allocation3 + $0x1] sm:$0x1] %vm562_vm8, %v609_v8  ;;  %v567_v9 = vpop.permute.xlu0 %566 }
 0x5a6   :  { %v615_v10 = vpop.permute.xlu1 %614 }
 0x5a7   :  { %617 = vst.msk [vmem:[#allocation3 + $0x1] sm:$0x1] %vm569_vm9, %v615_v10  ;;  %v574_v11 = vpop.permute.xlu0 %573 }
 0x5aa   :  { %v621_v12 = vpop.permute.xlu1 %620 }
 0x5ab   :  { %623 = vst.msk [vmem:[#allocation3 + $0x1] sm:$0x1] %vm576_vm10, %v621_v12  ;;  %v581_v13 = vpop.permute.xlu0 %580 }
 0x5ae   :  { %v546_v15 = vpop.permute.xlu1 %545 }
 0x5af   :  { %549 = vst.msk [vmem:[#allocation3] sm:$0x1] %vm548_vm6, %v546_v15  ;;  %v588_v17 = vpop.permute.xlu0 %587  ;;  %vm1368_vm6 = vcmask 49200  }
 0x5b0   :  { %556 = vst.msk [vmem:[#allocation3] sm:$0x1] %vm555_vm7, %v553_v2  ;;  %vm1375_vm7 = vcmask 57400  }
 0x5b1   :  { %563 = vst.msk [vmem:[#allocation3] sm:$0x1] %vm562_vm8, %v560_v7 }
 0x5b2   :  { %570 = vst.msk [vmem:[#allocation3] sm:$0x1] %vm569_vm9, %v567_v9  ;;  %v627_v16 = vpop.permute.xlu1 %626 }
 0x5b3   :  { %577 = vst.msk [vmem:[#allocation3] sm:$0x1] %vm576_vm10, %v574_v11 }
 0x5b4   :  { %629 = vst.msk [vmem:[#allocation3 + $0x1] sm:$0x1] %vm583_vm11, %v627_v16  ;;  %584 = vst.msk [vmem:[#allocation3] sm:$0x1] %vm583_vm11, %v581_v13 }
 0x5b5   :  { %591 = vst.msk [vmem:[#allocation3] sm:$0x1] %vm590_vm12, %v588_v17 }
 0x5b6   :  { %v633_v18 = vpop.permute.xlu1 %632 }
 0x5b7   :  { %635 = vst.msk [vmem:[#allocation3 + $0x1] sm:$0x1] %vm590_vm12, %v633_v18 }
 0x5be   :  { %v640_v19 = vld [vmem:[#allocation3] sm:$0x3] }
 0x5bf   :  { %1565 = vmatmul.mubr.msk.f32.vlgmr.msra.gmra.mrb[6].mxu0 %vm646_vm13, %v640_v19 }
 0x692   :  { %v716_v21 = vpop.f32.mrb[6].mxu0 }
 0x693   :  { %v717_v22 = vadd.f32 %v1451_v20, %v716_v21  ;;  %v1566_v23 = vpop.f32.mrb[7].mxu0 }
 0x695   :  { %721 = vst.msk [vmem:[#allocation4] sm:$0x3] %vm720_vm14, %v717_v22 }
 0x69c   :  { %v722_v24 = vld [vmem:[#allocation4] sm:$0x1]  ;;  %v766_v25 = vld [vmem:[#allocation4 + $0x1] sm:$0x1] }
 0x69d   :  { %v730_v26 = vld [vmem:[#allocation4] sm:$0x1]  ;;  %767 = vst.msk [vmem:[#allocation5 + $0x8] sm:$0x1] %vm541_vm4, %v766_v25  ;;  %723 = vst.msk [vmem:[#allocation5] sm:$0x1] %vm541_vm4, %v722_v24 }
 0x69e   :  { %732 = vrot.lane.b32.xlu1 %v730_v26, %s1717_s25  ;;  %v724_v27 = vld [vmem:[#allocation4] sm:$0x1]  ;;  %v768_v32 = vld [vmem:[#allocation4 + $0x1] sm:$0x1] }
 0x69f   :  { %726 = vrot.lane.b32.xlu0 %v724_v27, %s1718_s27  ;;  %v742_v28 = vld [vmem:[#allocation4] sm:$0x1]  ;;  %v780_v34 = vld [vmem:[#allocation4 + $0x1] sm:$0x1] }
 0x6a0   :  { %v736_v29 = vld [vmem:[#allocation4] sm:$0x1]  ;;  %v774_v35 = vld [vmem:[#allocation4 + $0x1] sm:$0x1] }
 0x6a1   :  { %v754_v30 = vld [vmem:[#allocation4] sm:$0x1]  ;;  %v792_v36 = vld [vmem:[#allocation4 + $0x1] sm:$0x1] }
 0x6a2   :  { %744 = vrot.lane.b32.xlu1 %v742_v28, %s1705_s26  ;;  %v748_v31 = vld [vmem:[#allocation4] sm:$0x1]  ;;  %v786_v37 = vld [vmem:[#allocation4 + $0x1] sm:$0x1] }
 0x6a3   :  { %738 = vrot.lane.b32.xlu0 %v736_v29, %s1719_s28  ;;  %v760_v33 = vld [vmem:[#allocation4] sm:$0x1]  ;;  %v804_v38 = vld [vmem:[#allocation4 + $0x1] sm:$0x1] }
 0x6a4   :  { %v798_v39 = vld [vmem:[#allocation4 + $0x1] sm:$0x1] }
 0x6a6   :  { %756 = vrot.lane.b32.xlu1 %v754_v30, %s1720_s29 }
 0x6a7   :  { %750 = vrot.lane.b32.xlu0 %v748_v31, %s1721_s30 }
 0x6aa   :  { %770 = vrot.lane.b32.xlu1 %v768_v32, %s1718_s27 }
 0x6ab   :  { %762 = vrot.lane.b32.xlu0 %v760_v33, %s1722_s0 }
 0x6ae   :  { %782 = vrot.lane.b32.xlu1 %v780_v34, %s1719_s28 }
 0x6af   :  { %776 = vrot.lane.b32.xlu0 %v774_v35, %s1717_s25 }
 0x6b2   :  { %794 = vrot.lane.b32.xlu1 %v792_v36, %s1721_s30 }
 0x6b3   :  { %788 = vrot.lane.b32.xlu0 %v786_v37, %s1705_s26 }
 0x6b6   :  { %806 = vrot.lane.b32.xlu1 %v804_v38, %s1722_s0 }
 0x6b7   :  { %800 = vrot.lane.b32.xlu0 %v798_v39, %s1720_s29 }
 0x6ba   :  { %983 = vrot.lane.b32.xlu1 %v1781_v4, %s1724_s2 }
 0x6bb   :  { %814 = vrot.lane.b32.xlu0 %v812_v40, %s1723_s7 }
 0x6bf   :  { %1677 = vrot.lane.b32.xlu0 %v1787_v6, %s1725_s10  ;;  %v1461_v6 = vld [vmem:[%s1916_s3 + $0x25] ss:$0 sm:$0xff] }
 0x710   :  { %v733_v41 = vpop.permute.xlu1 %732 }
 0x711   :  { %735 = vst.msk [vmem:[#allocation5 + $0x2] sm:$0x1] %vm541_vm4, %v733_v41  ;;  %v727_v42 = vpop.permute.xlu0 %726 }
 0x712   :  { %729 = vst.msk [vmem:[#allocation5 + $0x1] sm:$0x1] %vm541_vm4, %v727_v42 }
 0x714   :  { %v745_v43 = vpop.permute.xlu1 %744 }
 0x715   :  { %747 = vst.msk [vmem:[#allocation5 + $0x4] sm:$0x1] %vm541_vm4, %v745_v43  ;;  %v739_v44 = vpop.permute.xlu0 %738 }
 0x716   :  { %741 = vst.msk [vmem:[#allocation5 + $0x3] sm:$0x1] %vm541_vm4, %v739_v44 }
 0x718   :  { %v757_v45 = vpop.permute.xlu1 %756 }
 0x719   :  { %759 = vst.msk [vmem:[#allocation5 + $0x6] sm:$0x1] %vm541_vm4, %v757_v45  ;;  %v751_v46 = vpop.permute.xlu0 %750 }
 0x71a   :  { %753 = vst.msk [vmem:[#allocation5 + $0x5] sm:$0x1] %vm541_vm4, %v751_v46 }
 0x71c   :  { %v771_v47 = vpop.permute.xlu1 %770 }
 0x71d   :  { %773 = vst.msk [vmem:[#allocation5 + $0x9] sm:$0x1] %vm541_vm4, %v771_v47  ;;  %v763_v48 = vpop.permute.xlu0 %762 }
 0x71e   :  { %765 = vst.msk [vmem:[#allocation5 + $0x7] sm:$0x1] %vm541_vm4, %v763_v48 }
 0x720   :  { %v783_v49 = vpop.permute.xlu1 %782 }
 0x721   :  { %785 = vst.msk [vmem:[#allocation5 + $0xb] sm:$0x1] %vm541_vm4, %v783_v49  ;;  %v777_v50 = vpop.permute.xlu0 %776 }
 0x722   :  { %779 = vst.msk [vmem:[#allocation5 + $0xa] sm:$0x1] %vm541_vm4, %v777_v50 }
 0x724   :  { %v795_v51 = vpop.permute.xlu1 %794 }
 0x725   :  { %797 = vst.msk [vmem:[#allocation5 + $0xd] sm:$0x1] %vm541_vm4, %v795_v51  ;;  %v789_v52 = vpop.permute.xlu0 %788  ;;  %v810_v53 = vld [vmem:[#allocation5] sm:$0xff] }
 0x726   :  { %791 = vst.msk [vmem:[#allocation5 + $0xc] sm:$0x1] %vm541_vm4, %v789_v52  ;;  %1569 = vmatprep.mubr.msk.f32.mxu1 %vm23_vm1, %v810_v53 }
 0x728   :  { %v807_v54 = vpop.permute.xlu1 %806 }
 0x729   :  { %809 = vst.msk [vmem:[#allocation5 + $0xf] sm:$0x1] %vm541_vm4, %v807_v54  ;;  %v801_v55 = vpop.permute.xlu0 %800 }
 0x72a   :  { %803 = vst.msk [vmem:[#allocation5 + $0xe] sm:$0x1] %vm541_vm4, %v801_v55  ;;  %vm1354_vm4 = vcmask 32800  }
 0x72c   :  { %v984_v61 = vpop.permute.xlu1 %983 }
 0x72d   :  { %v815_v56 = vpop.permute.xlu0 %814  ;;  %1579 = vmatprep.subr.mxu0 %v984_v61 }
 0x72e   :  { %1567 = vmatprep.subr.msk.mxu1 %vm30_vm0, %v815_v56  ;;  %1580 = vmatpush3.msra.mxu0 %v984_v61 }
 0x72f   :  { %1568 = vmatpush3.msk.msra.mxu1 %vm30_vm0, %v815_v56  ;;  %vm1326_vm0 = vcmask 0  }
 0x731   :  { %v811_v57 = vld [vmem:[#allocation5 + $0x8] sm:$0xff]  ;;  %v1678_v7 = vpop.permute.xlu0 %1677 }
 0x732   :  { %1570 = vmatmul.mubr.msk.f32.vlgmr.msra.gmra.mrb[6].mxu1 %vm23_vm1, %v811_v57  ;;  %v1680_v8 = vunpack.i.h.bf16 %v1678_v7  ;;  %v1679_v9 = vunpack.i.l.bf16 %v1678_v7  ;;  %vm1333_vm1 = vcmask 8200  }
 0x733   :  { %1576 = vmatprep.mubr.msk.f32.mxu1 %vm114_vm2, %v1774_v3 }
 0x734   :  { %v1635_v10 = vpack.c.bf16 %v1680_v8, %v1679_v9 }
 0x736   :  { %1636 = vmatprep.subr.bf16.mxu0 %v1635_v10 }
 0x805   :  { %v1571_v58 = vpop.f32.mrb[6].mxu1 }
 0x806   :  { %v890_v59 = vpop.f32.mrb[7].mxu1 }
 0x807   :  { %v1627_v60 = vpack.c.bf16 %v1571_v58, %v890_v59 }
 0x809   :  { %1628 = vmatprep.subr.bf16.mxu1 %v1627_v60 }
 0x80a   :  { %1630 = vmatpush3.bf16.msra.mxu1 %v1627_v60 }
 0x80d   :  { %1577 = vmatmul.mubr.msk.f32.vlgmr.msra.gmra.mrb[8].mxu1 %vm114_vm2, %v1794_v14 }
 0x80e   :  { %1588 = vmatprep.mubr.msk.f32.mxu1 %vm114_vm2, %v1774_v3 }
 0x8e0   :  { %v1578_v63 = vpop.f32.mrb[8].mxu1 }
 0x8e1   :  { %v976_v4 = vadd.f32 %v1578_v63, %v1456_v62  ;;  %v970_v0 = vpop.f32.mrb[9].mxu1 }
 0x8e2   :  { %v971_v1 = vadd.f32 %v1456_v62, %v970_v0 }
 0x8e3   :  { %v980_v5 = vmax.f32 %v976_v4, 0.0 }
 0x8e4   :  { %v979_v2 = vmax.f32 %v971_v1, 0.0 }
 0x8e6   :  { %1581 = vmatprep.mubr.msk.f32.mxu0 %vm376_vm3, %v979_v2 }
 0x8e7   :  { %1582 = vmatmul.mubr.msk.f32.vlgmr.msra.gmra.mrb[8].mxu0 %vm376_vm3, %v980_v5  ;;  %vm1347_vm3 = vcmask 24600  }
 0x8e8   :  { %1638 = vmatpush3.bf16.msra.mxu0 %v1635_v10 }
 0x9ba   :  { %v1583_v11 = vpop.f32.mrb[8].mxu0 }
 0x9bb   :  { %v1058_v12 = vpop.f32.mrb[9].mxu0 }
 0x9bc   :  { %v1631_v13 = vpack.c.bf16 %v1583_v11, %v1058_v12 }
 0x9be   :  { %1632 = vmatprep.subr.bf16.mxu1 %v1631_v13 }
 0x9bf   :  { %1634 = vmatpush3.bf16.msra.mxu1 %v1631_v13 }
 0x9c2   :  { %1589 = vmatmul.mubr.msk.f32.vlgmr.msra.gmra.mrb[10].mxu1 %vm114_vm2, %v1794_v14 }
 0x9c3   :  { %1602 = vmatprep.mubr.msk.f32.mxu1 %vm114_vm2, %v1774_v3  ;;  %v1466_v3 = vld [vmem:[%s1916_s3 + $0x26] ss:$0 sm:$0xff]  ;;  %s1728_s3 = smov 3  }
 0xa95   :  { %v1590_v15 = vpop.f32.mrb[10].mxu1 }
 0xa96   :  { %v1144_v16 = vadd.f32 %v1590_v15, %v1461_v6  ;;  %v1138_v17 = vpop.f32.mrb[11].mxu1 }
 0xa97   :  { %v1139_v18 = vadd.f32 %v1461_v6, %v1138_v17 }
 0xa98   :  { %v1148_v20 = vmax.f32 %v1144_v16, 0.0 }
 0xa99   :  { %v1147_v19 = vmax.f32 %v1139_v18, 0.0 }
 0xa9b   :  { %1595 = vmatprep.mubr.msk.f32.mxu0 %vm114_vm2, %v1147_v19 }
 0xa9c   :  { %1596 = vmatmul.mubr.msk.f32.vlgmr.msra.gmra.mrb[10].mxu0 %vm114_vm2, %v1148_v20 }
 0xb6f   :  { %v1597_v21 = vpop.f32.mrb[10].mxu0 }
 0xb70   :  { %v1231_v22 = vpop.f32.mrb[11].mxu0 }
 0xb71   :  { %v1639_v23 = vpack.c.bf16 %v1597_v21, %v1231_v22 }
 0xb73   :  { %1640 = vmatprep.subr.bf16.mxu1 %v1639_v23 }
 0xb74   :  { %1642 = vmatpush3.bf16.msra.mxu1 %v1639_v23 }
 0xb77   :  { %1603 = vmatmul.mubr.msk.f32.vlgmr.msra.gmra.mrb[12].mxu1 %vm114_vm2, %v1794_v14  ;;  %vm1340_vm2 = vcmask 16400  }
 0xc4a   :  { %v1604_v24 = vpop.f32.mrb[12].mxu1 }
 0xc4b   :  { %v1317_v25 = vadd.f32 %v1604_v24, %v1466_v3  ;;  %v1311_v26 = vpop.f32.mrb[13].mxu1 }
 0xc4c   :  { %v1312_v27 = vadd.f32 %v1466_v3, %v1311_v26 }
 0xc4d   :  { %v1321_v28 = vmax.f32 %v1317_v25, 0.0 }
 0xc4e   :  { %v1320_v29 = vmax.f32 %v1312_v27, 0.0 }
 0xc4f   :  { %1324 = vst.msk [vmem:[#allocation6 + $0x8] sm:$0xff] %vm1322_vm15, %v1321_v28 }
 0xc50   :  { %1323 = vst.msk [vmem:[#allocation6] sm:$0xff] %vm1322_vm15, %v1320_v29 }
 0xc56   :  { %v1379_v30 = vld [vmem:[#allocation6 + $0x9] sm:$0x1]  ;;  %v1385_v14 = vld [vmem:[#allocation6 + $0xa] sm:$0x1]  ;;  %v1377_v32 = vld [vmem:[#allocation6 + $0x8] sm:$0x1] }
 0xc57   :  { %1381 = vrot.lane.b32.xlu0 %v1379_v30, %s1726_s15  ;;  %v1328_v31 = vld [vmem:[#allocation6 + $0x1] sm:$0x1]  ;;  %v1335_v33 = vld [vmem:[#allocation6 + $0x2] sm:$0x1]  ;;  %1378 = vst.msk [vmem:[#allocation7 + $0x1] sm:$0x1] %vm1326_vm0, %v1377_v32 }
 0xc58   :  { %1330 = vrot.lane.b32.xlu1 %v1328_v31, %s1726_s15  ;;  %v1325_v34 = vld [vmem:[#allocation6] sm:$0x1]  ;;  %v1391_v35 = vld [vmem:[#allocation6 + $0xb] sm:$0x1]  ;;  %v1342_v36 = vld [vmem:[#allocation6 + $0x3] sm:$0x1] }
 0xc59   :  { %1327 = vst.msk [vmem:[#allocation7] sm:$0x1] %vm1326_vm0, %v1325_v34  ;;  %v1397_v37 = vld [vmem:[#allocation6 + $0xc] sm:$0x1]  ;;  %v1349_v38 = vld [vmem:[#allocation6 + $0x4] sm:$0x1] }
 0xc5a   :  { %v1403_v39 = vld [vmem:[#allocation6 + $0xd] sm:$0x1]  ;;  %v1356_v40 = vld [vmem:[#allocation6 + $0x5] sm:$0x1]  ;;  %v1409_v41 = vld [vmem:[#allocation6 + $0xe] sm:$0x1] }
 0xc5b   :  { %1387 = vrot.lane.b32.xlu0 %v1385_v14, %s1727_s16  ;;  %v1363_v42 = vld [vmem:[#allocation6 + $0x6] sm:$0x1]  ;;  %v1415_v43 = vld [vmem:[#allocation6 + $0xf] sm:$0x1]  ;;  %v1370_v44 = vld [vmem:[#allocation6 + $0x7] sm:$0x1] }
 0xc5c   :  { %1337 = vrot.lane.b32.xlu1 %v1335_v33, %s1727_s16 }
 0xc5f   :  { %1393 = vrot.lane.b32.xlu0 %v1391_v35, %s1728_s3 }
 0xc60   :  { %1344 = vrot.lane.b32.xlu1 %v1342_v36, %s1728_s3 }
 0xc63   :  { %1399 = vrot.lane.b32.xlu0 %v1397_v37, %s1707_s9 }
 0xc64   :  { %1351 = vrot.lane.b32.xlu1 %v1349_v38, %s1707_s9  ;;  %s1732_s9 = smov [#allocation7]  }
 0xc65   :  { %s1427_s20 = sshll.u32 %s1732_s9, 4  ;;  %s1428_s20 = int_to_ptr.vmem [resolvable:$true] %s1427_s20 }
 0xc66   :  { %s1681_s21 = scalar_lea.vmem %s1428_s20, 32  ;;  %p1686_p1 = scmp.lt.s32.totalorder %s1428_s20, %s1428_s20 }
 0xc67   :  { %1405 = vrot.lane.b32.xlu0 %v1403_v39, %s1729_s17  ;;  %p1682_p0 = scmp.ne.s32.totalorder %s1428_s20, %s1681_s21  ;;  %p1687_p2 = scmp.lt.s32.totalorder %s1681_s21, %s1681_s21 }
 0xc68   :  { %1358 = vrot.lane.b32.xlu1 %v1356_v40, %s1729_s17 }
 0xc69   :  { %p1688_p3 = por %p1687_p2, %p1686_p1 }
 0xc6b   :  { %1411 = vrot.lane.b32.xlu0 %v1409_v41, %s1730_s18  ;;  %p1689_p4 = pnand %p1688_p3, %p1682_p0 }
 0xc6c   :  { %1365 = vrot.lane.b32.xlu1 %v1363_v42, %s1730_s18 }
 0xc6f   :  { %1417 = vrot.lane.b32.xlu0 %v1415_v43, %s1731_s19 }
 0xc70   :  { %1372 = vrot.lane.b32.xlu1 %v1370_v44, %s1731_s19 }
 0xcc9   :  { %v1382_v45 = vpop.permute.xlu0 %1381 }
 0xcca   :  { %1384 = vst.msk [vmem:[#allocation7 + $0x1] sm:$0x1] %vm1333_vm1, %v1382_v45  ;;  %v1331_v46 = vpop.permute.xlu1 %1330 }
 0xccb   :  { %1334 = vst.msk [vmem:[#allocation7] sm:$0x1] %vm1333_vm1, %v1331_v46 }
 0xccd   :  { %v1388_v47 = vpop.permute.xlu0 %1387 }
 0xcce   :  { %1390 = vst.msk [vmem:[#allocation7 + $0x1] sm:$0x1] %vm1340_vm2, %v1388_v47  ;;  %v1338_v48 = vpop.permute.xlu1 %1337 }
 0xccf   :  { %1341 = vst.msk [vmem:[#allocation7] sm:$0x1] %vm1340_vm2, %v1338_v48 }
 0xcd1   :  { %v1394_v49 = vpop.permute.xlu0 %1393 }
 0xcd2   :  { %1396 = vst.msk [vmem:[#allocation7 + $0x1] sm:$0x1] %vm1347_vm3, %v1394_v49  ;;  %v1345_v50 = vpop.permute.xlu1 %1344 }
 0xcd3   :  { %1348 = vst.msk [vmem:[#allocation7] sm:$0x1] %vm1347_vm3, %v1345_v50 }
 0xcd5   :  { %v1400_v51 = vpop.permute.xlu0 %1399 }
 0xcd6   :  { %1402 = vst.msk [vmem:[#allocation7 + $0x1] sm:$0x1] %vm1354_vm4, %v1400_v51  ;;  %v1352_v52 = vpop.permute.xlu1 %1351 }
 0xcd7   :  { %1355 = vst.msk [vmem:[#allocation7] sm:$0x1] %vm1354_vm4, %v1352_v52 }
 0xcd9   :  { %v1406_v53 = vpop.permute.xlu0 %1405 }
 0xcda   :  { %1408 = vst.msk [vmem:[#allocation7 + $0x1] sm:$0x1] %vm1361_vm5, %v1406_v53  ;;  %v1359_v54 = vpop.permute.xlu1 %1358 }
 0xcdb   :  { %1362 = vst.msk [vmem:[#allocation7] sm:$0x1] %vm1361_vm5, %v1359_v54 }
 0xcdd   :  { %v1412_v55 = vpop.permute.xlu0 %1411 }
 0xcde   :  { %1414 = vst.msk [vmem:[#allocation7 + $0x1] sm:$0x1] %vm1368_vm6, %v1412_v55  ;;  %v1366_v56 = vpop.permute.xlu1 %1365 }
 0xcdf   :  { %1369 = vst.msk [vmem:[#allocation7] sm:$0x1] %vm1368_vm6, %v1366_v56 }
 0xce1   :  { %v1418_v57 = vpop.permute.xlu0 %1417 }
 0xce2   :  { %1420 = vst.msk [vmem:[#allocation7 + $0x1] sm:$0x1] %vm1375_vm7, %v1418_v57  ;;  %v1373_v58 = vpop.permute.xlu1 %1372 }
 0xce3   :  { %1376 = vst.msk [vmem:[#allocation7] sm:$0x1] %vm1375_vm7, %v1373_v58 }
 0xce4   :  { %1692 = shalt.err (!%p1689_p4)
}
 0xce5   :  { %s1693_s1 = scalar_lea.hbm %s1917_s4, 32 }
 0xce6   :  { %p1694_p5 = scmp.ne.s32.totalorder %s1917_s4, %s1693_s1  ;;  %p1697_p6 = scmp.lt.u32.totalorder %s1693_s1, %s1917_s4 }
 0xce8   :  { %p1699_p7 = pnand %p1697_p6, %p1694_p5 }
 0xcea   :  { %1702 = shalt.err (!%p1699_p7)
}
 0xceb   :  { %1430 = dma.vmem_to_hbm [thread:$0]  %s1428_s20, 32, %s1917_s4, [#allocation8]  }
 0xcec   :  { %1703 = dma.done.wait [#allocation8], 32  }
 0xced   :  { %1704 = vsyncadd [#allocation8], 4294967264 }
 0xcee   :  { %1434 = vsyncpa [#allocation8], 1 }

</bundles_post_ra>
